<compile_context>
chip_gen: v6e
topology: v6e:2x2x1
jax: 0.10.0
libtpu: 0.0.40
codegen_flags: <defaults>
</compile_context>

<pallas_src>
import jax
import jax.numpy as jnp
from jax.experimental import pallas as pl
from jax.experimental.pallas import tpu as pltpu


def lstm_kernel(lens_ref, x_ref, wih_ref, whh_ref, b_ref, wout_ref, bout_ref,
                out_ref, gx_scr):
    T, B, G = gx_scr.shape                 # G = 4*H
    H = G // 4

    # ---- one batched input projection for all timesteps (bias folded here, once) ----
    gates_in = (jnp.dot(x_ref[...], wih_ref[...], preferred_element_type=jnp.float32)
                + b_ref[...])                               # (T*B, 4H)
    gx_scr[...] = gates_in.reshape(T, B, G)                 # layout-free split of leading dim

    # ---- loop-invariant loads / masks, hoisted out of the recurrence ----
    lens = lens_ref[...]                                    # (B, 1) int32
    whh = whh_ref[...]                                      # (H, 4H)
    lane = jax.lax.broadcasted_iota(jnp.int32, (B, G), 1)
    is_g_lane = (lane >= 2 * H) & (lane < 3 * H)            # tanh gate lanes (torch order i,f,g,o)

    def step(t, carry):
        h, c, last_h = carry
        gates = gx_scr[t] + jnp.dot(h, whh, preferred_element_type=jnp.float32)  # (B, 4H)
        # One full-vreg tanh + one full-vreg sigmoid, combined by lane select.
        act = jnp.where(is_g_lane, jnp.tanh(gates), jax.nn.sigmoid(gates))
        i_g = act[:, 0:H]
        f_g = act[:, H:2 * H]
        g_g = act[:, 2 * H:3 * H]
        o_g = act[:, 3 * H:4 * H]
        c_new = f_g * c + i_g * g_g
        h_new = o_g * jnp.tanh(c_new)
        # Capture hidden state at the last valid timestep of each row
        # (== pack_padded_sequence + lstm_out[seq_len-1][i]).
        last_h = jnp.where(lens == (t + 1), h_new, last_h)
        return h_new, c_new, last_h

    zeros = jnp.zeros((B, H), jnp.float32)
    _, _, last_h = jax.lax.fori_loop(0, T, step, (zeros, zeros, zeros), unroll=True)

    out_ref[...] = (jnp.dot(last_h, wout_ref[...], preferred_element_type=jnp.float32)
                    + bout_ref[...]).astype(out_ref.dtype)


@jax.jit
def lstm_forward(sentences, seq_lens, params):
    # Embedding lookup + layout transpose = glue (plain JAX).
    emb = params["embedding"][sentences]             # (B, T, E)
    x = jnp.transpose(emb, (1, 0, 2))                # (T, B, E) time-major
    T, B, E = x.shape
    H = params["w_hh"].shape[0]
    O = params["w_out"].shape[1]

    x2d = x.reshape(T * B, E)                        # one slab for the batched input projection
    wih = params["w_ih"]                             # (E, 4H)
    whh = params["w_hh"]                             # (H, 4H)
    b = (params["b_ih"] + params["b_hh"]).reshape(1, 4 * H)
    wout = params["w_out"]                           # (H, O)
    bout = params["b_out"].reshape(1, O)
    # NOTE: valid lengths are expected in 1..T (pack_padded_sequence semantics);
    # rows with length 0 or >T would keep last_h == 0.
    lens2d = seq_lens.astype(jnp.int32).reshape(B, 1)

    return pl.pallas_call(
        lstm_kernel,
        out_shape=jax.ShapeDtypeStruct((B, O), jnp.float32),
        grid_spec=pltpu.PrefetchScalarGridSpec(
            num_scalar_prefetch=0,
            grid=(1,),                                       # single step; recurrence is in-kernel
            in_specs=[
                pl.BlockSpec((B, 1), lambda i: (0, 0)),          # seq_lens
                pl.BlockSpec((T * B, E), lambda i: (0, 0)),      # all timesteps, resident in VMEM
                pl.BlockSpec((E, 4 * H), lambda i: (0, 0)),      # W_ih^T
                pl.BlockSpec((H, 4 * H), lambda i: (0, 0)),      # W_hh^T
                pl.BlockSpec((1, 4 * H), lambda i: (0, 0)),      # b_ih + b_hh
                pl.BlockSpec((H, O), lambda i: (0, 0)),          # hidden2tag W^T
                pl.BlockSpec((1, O), lambda i: (0, 0)),          # hidden2tag b
            ],
            out_specs=pl.BlockSpec((B, O), lambda i: (0, 0)),
            scratch_shapes=[pltpu.VMEM((T, B, 4 * H), jnp.float32)],  # precomputed x@W_ih + b
        ),
        compiler_params=pltpu.CompilerParams(
            dimension_semantics=("arbitrary",)),
    )(lens2d, x2d, wih, whh, b, wout, bout)


def ref_forward(sentences, seq_lens, params):
    """Pure-JAX reference matching the PyTorch forward semantics."""
    emb = params["embedding"][sentences]
    x = jnp.transpose(emb, (1, 0, 2))                # (T, B, E)
    B = x.shape[1]
    H = params["w_hh"].shape[0]

    def step(carry, xt):
        h, c = carry
        gates = (xt @ params["w_ih"] + h @ params["w_hh"]
                 + params["b_ih"] + params["b_hh"])
        i, f, g, o = jnp.split(gates, 4, axis=-1)
        i, f, o = jax.nn.sigmoid(i), jax.nn.sigmoid(f), jax.nn.sigmoid(o)
        g = jnp.tanh(g)
        c = f * c + i * g
        h = o * jnp.tanh(c)
        return (h, c), h

    init = (jnp.zeros((B, H), jnp.float32), jnp.zeros((B, H), jnp.float32))
    _, hs = jax.lax.scan(step, init, x)              # (T, B, H)
    last = hs[seq_lens - 1, jnp.arange(B)]           # gather at seq_len-1
    return last @ params["w_out"] + params["b_out"]


def init_params(key, vocab_size, embed_dim, hidden_dim, output_dim):
    ks = jax.random.split(key, 7)
    k_lstm = 1.0 / jnp.sqrt(hidden_dim)
    k_lin = 1.0 / jnp.sqrt(hidden_dim)
    return {
        "embedding": jax.random.normal(ks[0], (vocab_size, embed_dim), jnp.float32),
        # stored pre-transposed: (E, 4H) / (H, 4H), torch gate order i,f,g,o
        "w_ih": jax.random.uniform(ks[1], (embed_dim, 4 * hidden_dim), jnp.float32,
                                   -k_lstm, k_lstm),
        "w_hh": jax.random.uniform(ks[2], (hidden_dim, 4 * hidden_dim), jnp.float32,
                                   -k_lstm, k_lstm),
        "b_ih": jax.random.uniform(ks[3], (4 * hidden_dim,), jnp.float32,
                                   -k_lstm, k_lstm),
        "b_hh": jax.random.uniform(ks[4], (4 * hidden_dim,), jnp.float32,
                                   -k_lstm, k_lstm),
        "w_out": jax.random.uniform(ks[5], (hidden_dim, output_dim), jnp.float32,
                                    -k_lin, k_lin),
        "b_out": jax.random.uniform(ks[6], (output_dim,), jnp.float32,
                                    -k_lin, k_lin),
    }


if __name__ == "__main__":
    VOCAB, EMBED, HIDDEN, OUT = 50, 16, 32, 8
    BATCH, SEQ = 8, 8

    key = jax.random.PRNGKey(0)
    k_params, k_tok = jax.random.split(key)
    params = init_params(k_params, VOCAB, EMBED, HIDDEN, OUT)

    sentences = jax.random.randint(k_tok, (BATCH, SEQ), 0, VOCAB, dtype=jnp.int32)
    # pack_padded_sequence expects lengths sorted descending, each in 1..SEQ.
    seq_lens = jnp.array([8, 7, 7, 5, 4, 3, 2, 1], dtype=jnp.int32)
    assert int(seq_lens.max()) <= SEQ and int(seq_lens.min()) >= 1

    tag_scores = lstm_forward(sentences, seq_lens, params)
    tag_scores = jax.block_until_ready(tag_scores)

    expected = ref_forward(sentences, seq_lens, params)
    assert tag_scores.shape == (BATCH, OUT)
    assert jnp.allclose(tag_scores, expected, atol=1e-5, rtol=1e-5), (
        "Pallas LSTM kernel mismatch vs JAX reference")

    print("KERNEL_OK")
</pallas_src>

<mosaic_0001>
module attributes {stable_mosaic.version = 11 : i64} {
  func.func @lstm_kernel(%arg0: i32, %arg1: memref<8x1xi32, #tpu.memory_space<vmem>>, %arg2: memref<64x16xf32, #tpu.memory_space<vmem>>, %arg3: memref<16x128xf32, #tpu.memory_space<vmem>>, %arg4: memref<32x128xf32, #tpu.memory_space<vmem>>, %arg5: memref<1x128xf32, #tpu.memory_space<vmem>>, %arg6: memref<32x8xf32, #tpu.memory_space<vmem>>, %arg7: memref<1x8xf32, #tpu.memory_space<vmem>>, %arg8: memref<8x8xf32, #tpu.memory_space<vmem>>, %arg9: memref<8x8x128xf32, #tpu.memory_space<vmem>>) attributes {dimension_semantics = [#tpu.dimension_semantics<arbitrary>], iteration_bounds = array<i64: 1>, scalar_prefetch = 0 : i64, scratch_operands = 1 : i64, tpu.core_type = #tpu.core_type<tc>, window_params = [{pipeline_mode = #tpu.pipeline_mode<synchronous>, transform_indices = @transform_0, window_bounds = array<i64: 8, 1>}, {pipeline_mode = #tpu.pipeline_mode<synchronous>, transform_indices = @transform_1, window_bounds = array<i64: 64, 16>}, {pipeline_mode = #tpu.pipeline_mode<synchronous>, transform_indices = @transform_2, window_bounds = array<i64: 16, 128>}, {pipeline_mode = #tpu.pipeline_mode<synchronous>, transform_indices = @transform_3, window_bounds = array<i64: 32, 128>}, {pipeline_mode = #tpu.pipeline_mode<synchronous>, transform_indices = @transform_4, window_bounds = array<i64: 1, 128>}, {pipeline_mode = #tpu.pipeline_mode<synchronous>, transform_indices = @transform_5, window_bounds = array<i64: 32, 8>}, {pipeline_mode = #tpu.pipeline_mode<synchronous>, transform_indices = @transform_6, window_bounds = array<i64: 1, 8>}, {pipeline_mode = #tpu.pipeline_mode<synchronous>, transform_indices = @transform_7, window_bounds = array<i64: 8, 8>}]} {
    %c0 = arith.constant 0 : index
    %c0_0 = arith.constant 0 : index
    %0 = vector.load %arg2[%c0, %c0_0] : memref<64x16xf32, #tpu.memory_space<vmem>>, vector<64x16xf32>
    %c0_1 = arith.constant 0 : index
    %c0_2 = arith.constant 0 : index
    %1 = vector.load %arg3[%c0_1, %c0_2] : memref<16x128xf32, #tpu.memory_space<vmem>>, vector<16x128xf32>
    %cst = arith.constant dense<0.000000e+00> : vector<64x128xf32>
    %2 = tpu.matmul %0, %1, %cst {dimension_numbers = #tpu.dot_dimension_numbers<[1], [0], [0], [1], [0, 0, 1, 1], [], []>} : vector<64x16xf32>, vector<16x128xf32>, vector<64x128xf32> -> vector<64x128xf32>
    %c0_3 = arith.constant 0 : index
    %c0_4 = arith.constant 0 : index
    %3 = vector.load %arg5[%c0_3, %c0_4] : memref<1x128xf32, #tpu.memory_space<vmem>>, vector<1x128xf32>
    %4 = vector.broadcast %3 : vector<1x128xf32> to vector<64x128xf32>
    %5 = arith.addf %2, %4 : vector<64x128xf32>
    %6 = vector.shape_cast %5 : vector<64x128xf32> to vector<8x8x128xf32>
    %c0_5 = arith.constant 0 : index
    %c0_6 = arith.constant 0 : index
    %c0_7 = arith.constant 0 : index
    %7 = vector.load %arg9[%c0_5, %c0_6, %c0_7] : memref<8x8x128xf32, #tpu.memory_space<vmem>>, vector<8x8x128xf32>
    tpu.vector_store %arg9[%c0_5, %c0_6, %c0_7], %6 {strides = array<i32>} : memref<8x8x128xf32, #tpu.memory_space<vmem>>, vector<8x8x128xf32>,
    %c0_8 = arith.constant 0 : index
    %c0_9 = arith.constant 0 : index
    %8 = vector.load %arg1[%c0_8, %c0_9] : memref<8x1xi32, #tpu.memory_space<vmem>>, vector<8x1xi32>
    %c0_10 = arith.constant 0 : index
    %c0_11 = arith.constant 0 : index
    %9 = vector.load %arg4[%c0_10, %c0_11] : memref<32x128xf32, #tpu.memory_space<vmem>>, vector<32x128xf32>
    %10 = tpu.iota {dimensions = array<i32: 1>} : vector<8x128xi32>
    %c64_i32 = arith.constant 64 : i32
    %11 = vector.broadcast %c64_i32 : i32 to vector<8x128xi32>
    %12 = arith.cmpi sge, %10, %11 : vector<8x128xi32>
    %c96_i32 = arith.constant 96 : i32
    %13 = vector.broadcast %c96_i32 : i32 to vector<8x128xi32>
    %14 = arith.cmpi slt, %10, %13 : vector<8x128xi32>
    %15 = arith.andi %12, %14 : vector<8x128xi1>
    %cst_12 = arith.constant 0.000000e+00 : f32
    %16 = vector.broadcast %cst_12 : f32 to vector<8x32xf32>
    %c0_i32 = arith.constant 0 : i32
    %17 = arith.index_cast %c0_i32 : i32 to index
    %c0_13 = arith.constant 0 : index
    %c0_14 = arith.constant 0 : index
    %18 = vector.load %arg9[%17, %c0_13, %c0_14] : memref<8x8x128xf32, #tpu.memory_space<vmem>>, vector<1x8x128xf32>
    %19 = vector.shape_cast %18 : vector<1x8x128xf32> to vector<8x128xf32>
    %cst_15 = arith.constant dense<0.000000e+00> : vector<8x128xf32>
    %20 = tpu.matmul %16, %9, %cst_15 {dimension_numbers = #tpu.dot_dimension_numbers<[1], [0], [0], [1], [0, 0, 1, 1], [], []>} : vector<8x32xf32>, vector<32x128xf32>, vector<8x128xf32> -> vector<8x128xf32>
    %21 = arith.addf %19, %20 : vector<8x128xf32>
    %22 = math.tanh %21 : vector<8x128xf32>
    %23 = arith.negf %21 : vector<8x128xf32>
    %24 = math.exp %23 : vector<8x128xf32>
    %cst_16 = arith.constant 1.000000e+00 : f32
    %25 = vector.broadcast %cst_16 : f32 to vector<8x128xf32>
    %26 = arith.addf %25, %24 : vector<8x128xf32>
    %27 = arith.divf %25, %26 : vector<8x128xf32>
    %28 = arith.select %15, %22, %27 : vector<8x128xi1>, vector<8x128xf32>
    %29 = vector.extract_strided_slice %28 {offsets = [0, 0], sizes = [8, 32], strides = [1, 1]} : vector<8x128xf32> to vector<8x32xf32>
    %30 = vector.extract_strided_slice %28 {offsets = [0, 32], sizes = [8, 32], strides = [1, 1]} : vector<8x128xf32> to vector<8x32xf32>
    %31 = vector.extract_strided_slice %28 {offsets = [0, 64], sizes = [8, 32], strides = [1, 1]} : vector<8x128xf32> to vector<8x32xf32>
    %32 = vector.extract_strided_slice %28 {offsets = [0, 96], sizes = [8, 32], strides = [1, 1]} : vector<8x128xf32> to vector<8x32xf32>
    %33 = arith.mulf %30, %16 : vector<8x32xf32>
    %34 = arith.mulf %29, %31 : vector<8x32xf32>
    %35 = arith.addf %33, %34 : vector<8x32xf32>
    %36 = math.tanh %35 : vector<8x32xf32>
    %37 = arith.mulf %32, %36 : vector<8x32xf32>
    %c1_i32 = arith.constant 1 : i32
    %38 = arith.addi %c0_i32, %c1_i32 : i32
    %39 = vector.broadcast %38 : i32 to vector<8x1xi32>
    %40 = arith.cmpi eq, %8, %39 : vector<8x1xi32>
    %41 = vector.shape_cast %40 : vector<8x1xi1> to vector<8x1xi1>
    %42 = vector.broadcast %41 : vector<8x1xi1> to vector<8x32xi1>
    %43 = arith.select %42, %37, %16 : vector<8x32xi1>, vector<8x32xf32>
    %c1_i32_17 = arith.constant 1 : i32
    %44 = arith.index_cast %c1_i32_17 : i32 to index
    %c0_18 = arith.constant 0 : index
    %c0_19 = arith.constant 0 : index
    %45 = vector.load %arg9[%44, %c0_18, %c0_19] : memref<8x8x128xf32, #tpu.memory_space<vmem>>, vector<1x8x128xf32>
    %46 = vector.shape_cast %45 : vector<1x8x128xf32> to vector<8x128xf32>
    %cst_20 = arith.constant dense<0.000000e+00> : vector<8x128xf32>
    %47 = tpu.matmul %37, %9, %cst_20 {dimension_numbers = #tpu.dot_dimension_numbers<[1], [0], [0], [1], [0, 0, 1, 1], [], []>} : vector<8x32xf32>, vector<32x128xf32>, vector<8x128xf32> -> vector<8x128xf32>
    %48 = arith.addf %46, %47 : vector<8x128xf32>
    %49 = math.tanh %48 : vector<8x128xf32>
    %50 = arith.negf %48 : vector<8x128xf32>
    %51 = math.exp %50 : vector<8x128xf32>
    %cst_21 = arith.constant 1.000000e+00 : f32
    %52 = vector.broadcast %cst_21 : f32 to vector<8x128xf32>
    %53 = arith.addf %52, %51 : vector<8x128xf32>
    %54 = arith.divf %52, %53 : vector<8x128xf32>
    %55 = arith.select %15, %49, %54 : vector<8x128xi1>, vector<8x128xf32>
    %56 = vector.extract_strided_slice %55 {offsets = [0, 0], sizes = [8, 32], strides = [1, 1]} : vector<8x128xf32> to vector<8x32xf32>
    %57 = vector.extract_strided_slice %55 {offsets = [0, 32], sizes = [8, 32], strides = [1, 1]} : vector<8x128xf32> to vector<8x32xf32>
    %58 = vector.extract_strided_slice %55 {offsets = [0, 64], sizes = [8, 32], strides = [1, 1]} : vector<8x128xf32> to vector<8x32xf32>
    %59 = vector.extract_strided_slice %55 {offsets = [0, 96], sizes = [8, 32], strides = [1, 1]} : vector<8x128xf32> to vector<8x32xf32>
    %60 = arith.mulf %57, %35 : vector<8x32xf32>
    %61 = arith.mulf %56, %58 : vector<8x32xf32>
    %62 = arith.addf %60, %61 : vector<8x32xf32>
    %63 = math.tanh %62 : vector<8x32xf32>
    %64 = arith.mulf %59, %63 : vector<8x32xf32>
    %c1_i32_22 = arith.constant 1 : i32
    %65 = arith.addi %c1_i32_17, %c1_i32_22 : i32
    %66 = vector.broadcast %65 : i32 to vector<8x1xi32>
    %67 = arith.cmpi eq, %8, %66 : vector<8x1xi32>
    %68 = vector.shape_cast %67 : vector<8x1xi1> to vector<8x1xi1>
    %69 = vector.broadcast %68 : vector<8x1xi1> to vector<8x32xi1>
    %70 = arith.select %69, %64, %43 : vector<8x32xi1>, vector<8x32xf32>
    %c2_i32 = arith.constant 2 : i32
    %71 = arith.index_cast %c2_i32 : i32 to index
    %c0_23 = arith.constant 0 : index
    %c0_24 = arith.constant 0 : index
    %72 = vector.load %arg9[%71, %c0_23, %c0_24] : memref<8x8x128xf32, #tpu.memory_space<vmem>>, vector<1x8x128xf32>
    %73 = vector.shape_cast %72 : vector<1x8x128xf32> to vector<8x128xf32>
    %cst_25 = arith.constant dense<0.000000e+00> : vector<8x128xf32>
    %74 = tpu.matmul %64, %9, %cst_25 {dimension_numbers = #tpu.dot_dimension_numbers<[1], [0], [0], [1], [0, 0, 1, 1], [], []>} : vector<8x32xf32>, vector<32x128xf32>, vector<8x128xf32> -> vector<8x128xf32>
    %75 = arith.addf %73, %74 : vector<8x128xf32>
    %76 = math.tanh %75 : vector<8x128xf32>
    %77 = arith.negf %75 : vector<8x128xf32>
    %78 = math.exp %77 : vector<8x128xf32>
    %cst_26 = arith.constant 1.000000e+00 : f32
    %79 = vector.broadcast %cst_26 : f32 to vector<8x128xf32>
    %80 = arith.addf %79, %78 : vector<8x128xf32>
    %81 = arith.divf %79, %80 : vector<8x128xf32>
    %82 = arith.select %15, %76, %81 : vector<8x128xi1>, vector<8x128xf32>
    %83 = vector.extract_strided_slice %82 {offsets = [0, 0], sizes = [8, 32], strides = [1, 1]} : vector<8x128xf32> to vector<8x32xf32>
    %84 = vector.extract_strided_slice %82 {offsets = [0, 32], sizes = [8, 32], strides = [1, 1]} : vector<8x128xf32> to vector<8x32xf32>
    %85 = vector.extract_strided_slice %82 {offsets = [0, 64], sizes = [8, 32], strides = [1, 1]} : vector<8x128xf32> to vector<8x32xf32>
    %86 = vector.extract_strided_slice %82 {offsets = [0, 96], sizes = [8, 32], strides = [1, 1]} : vector<8x128xf32> to vector<8x32xf32>
    %87 = arith.mulf %84, %62 : vector<8x32xf32>
    %88 = arith.mulf %83, %85 : vector<8x32xf32>
    %89 = arith.addf %87, %88 : vector<8x32xf32>
    %90 = math.tanh %89 : vector<8x32xf32>
    %91 = arith.mulf %86, %90 : vector<8x32xf32>
    %c1_i32_27 = arith.constant 1 : i32
    %92 = arith.addi %c2_i32, %c1_i32_27 : i32
    %93 = vector.broadcast %92 : i32 to vector<8x1xi32>
    %94 = arith.cmpi eq, %8, %93 : vector<8x1xi32>
    %95 = vector.shape_cast %94 : vector<8x1xi1> to vector<8x1xi1>
    %96 = vector.broadcast %95 : vector<8x1xi1> to vector<8x32xi1>
    %97 = arith.select %96, %91, %70 : vector<8x32xi1>, vector<8x32xf32>
    %c3_i32 = arith.constant 3 : i32
    %98 = arith.index_cast %c3_i32 : i32 to index
    %c0_28 = arith.constant 0 : index
    %c0_29 = arith.constant 0 : index
    %99 = vector.load %arg9[%98, %c0_28, %c0_29] : memref<8x8x128xf32, #tpu.memory_space<vmem>>, vector<1x8x128xf32>
    %100 = vector.shape_cast %99 : vector<1x8x128xf32> to vector<8x128xf32>
    %cst_30 = arith.constant dense<0.000000e+00> : vector<8x128xf32>
    %101 = tpu.matmul %91, %9, %cst_30 {dimension_numbers = #tpu.dot_dimension_numbers<[1], [0], [0], [1], [0, 0, 1, 1], [], []>} : vector<8x32xf32>, vector<32x128xf32>, vector<8x128xf32> -> vector<8x128xf32>
    %102 = arith.addf %100, %101 : vector<8x128xf32>
    %103 = math.tanh %102 : vector<8x128xf32>
    %104 = arith.negf %102 : vector<8x128xf32>
    %105 = math.exp %104 : vector<8x128xf32>
    %cst_31 = arith.constant 1.000000e+00 : f32
    %106 = vector.broadcast %cst_31 : f32 to vector<8x128xf32>
    %107 = arith.addf %106, %105 : vector<8x128xf32>
    %108 = arith.divf %106, %107 : vector<8x128xf32>
    %109 = arith.select %15, %103, %108 : vector<8x128xi1>, vector<8x128xf32>
    %110 = vector.extract_strided_slice %109 {offsets = [0, 0], sizes = [8, 32], strides = [1, 1]} : vector<8x128xf32> to vector<8x32xf32>
    %111 = vector.extract_strided_slice %109 {offsets = [0, 32], sizes = [8, 32], strides = [1, 1]} : vector<8x128xf32> to vector<8x32xf32>
    %112 = vector.extract_strided_slice %109 {offsets = [0, 64], sizes = [8, 32], strides = [1, 1]} : vector<8x128xf32> to vector<8x32xf32>
    %113 = vector.extract_strided_slice %109 {offsets = [0, 96], sizes = [8, 32], strides = [1, 1]} : vector<8x128xf32> to vector<8x32xf32>
    %114 = arith.mulf %111, %89 : vector<8x32xf32>
    %115 = arith.mulf %110, %112 : vector<8x32xf32>
    %116 = arith.addf %114, %115 : vector<8x32xf32>
    %117 = math.tanh %116 : vector<8x32xf32>
    %118 = arith.mulf %113, %117 : vector<8x32xf32>
    %c1_i32_32 = arith.constant 1 : i32
    %119 = arith.addi %c3_i32, %c1_i32_32 : i32
    %120 = vector.broadcast %119 : i32 to vector<8x1xi32>
    %121 = arith.cmpi eq, %8, %120 : vector<8x1xi32>
    %122 = vector.shape_cast %121 : vector<8x1xi1> to vector<8x1xi1>
    %123 = vector.broadcast %122 : vector<8x1xi1> to vector<8x32xi1>
    %124 = arith.select %123, %118, %97 : vector<8x32xi1>, vector<8x32xf32>
    %c4_i32 = arith.constant 4 : i32
    %125 = arith.index_cast %c4_i32 : i32 to index
    %c0_33 = arith.constant 0 : index
    %c0_34 = arith.constant 0 : index
    %126 = vector.load %arg9[%125, %c0_33, %c0_34] : memref<8x8x128xf32, #tpu.memory_space<vmem>>, vector<1x8x128xf32>
    %127 = vector.shape_cast %126 : vector<1x8x128xf32> to vector<8x128xf32>
    %cst_35 = arith.constant dense<0.000000e+00> : vector<8x128xf32>
    %128 = tpu.matmul %118, %9, %cst_35 {dimension_numbers = #tpu.dot_dimension_numbers<[1], [0], [0], [1], [0, 0, 1, 1], [], []>} : vector<8x32xf32>, vector<32x128xf32>, vector<8x128xf32> -> vector<8x128xf32>
    %129 = arith.addf %127, %128 : vector<8x128xf32>
    %130 = math.tanh %129 : vector<8x128xf32>
    %131 = arith.negf %129 : vector<8x128xf32>
    %132 = math.exp %131 : vector<8x128xf32>
    %cst_36 = arith.constant 1.000000e+00 : f32
    %133 = vector.broadcast %cst_36 : f32 to vector<8x128xf32>
    %134 = arith.addf %133, %132 : vector<8x128xf32>
    %135 = arith.divf %133, %134 : vector<8x128xf32>
    %136 = arith.select %15, %130, %135 : vector<8x128xi1>, vector<8x128xf32>
    %137 = vector.extract_strided_slice %136 {offsets = [0, 0], sizes = [8, 32], strides = [1, 1]} : vector<8x128xf32> to vector<8x32xf32>
    %138 = vector.extract_strided_slice %136 {offsets = [0, 32], sizes = [8, 32], strides = [1, 1]} : vector<8x128xf32> to vector<8x32xf32>
    %139 = vector.extract_strided_slice %136 {offsets = [0, 64], sizes = [8, 32], strides = [1, 1]} : vector<8x128xf32> to vector<8x32xf32>
    %140 = vector.extract_strided_slice %136 {offsets = [0, 96], sizes = [8, 32], strides = [1, 1]} : vector<8x128xf32> to vector<8x32xf32>
    %141 = arith.mulf %138, %116 : vector<8x32xf32>
    %142 = arith.mulf %137, %139 : vector<8x32xf32>
    %143 = arith.addf %141, %142 : vector<8x32xf32>
    %144 = math.tanh %143 : vector<8x32xf32>
    %145 = arith.mulf %140, %144 : vector<8x32xf32>
    %c1_i32_37 = arith.constant 1 : i32
    %146 = arith.addi %c4_i32, %c1_i32_37 : i32
    %147 = vector.broadcast %146 : i32 to vector<8x1xi32>
    %148 = arith.cmpi eq, %8, %147 : vector<8x1xi32>
    %149 = vector.shape_cast %148 : vector<8x1xi1> to vector<8x1xi1>
    %150 = vector.broadcast %149 : vector<8x1xi1> to vector<8x32xi1>
    %151 = arith.select %150, %145, %124 : vector<8x32xi1>, vector<8x32xf32>
    %c5_i32 = arith.constant 5 : i32
    %152 = arith.index_cast %c5_i32 : i32 to index
    %c0_38 = arith.constant 0 : index
    %c0_39 = arith.constant 0 : index
    %153 = vector.load %arg9[%152, %c0_38, %c0_39] : memref<8x8x128xf32, #tpu.memory_space<vmem>>, vector<1x8x128xf32>
    %154 = vector.shape_cast %153 : vector<1x8x128xf32> to vector<8x128xf32>
    %cst_40 = arith.constant dense<0.000000e+00> : vector<8x128xf32>
    %155 = tpu.matmul %145, %9, %cst_40 {dimension_numbers = #tpu.dot_dimension_numbers<[1], [0], [0], [1], [0, 0, 1, 1], [], []>} : vector<8x32xf32>, vector<32x128xf32>, vector<8x128xf32> -> vector<8x128xf32>
    %156 = arith.addf %154, %155 : vector<8x128xf32>
    %157 = math.tanh %156 : vector<8x128xf32>
    %158 = arith.negf %156 : vector<8x128xf32>
    %159 = math.exp %158 : vector<8x128xf32>
    %cst_41 = arith.constant 1.000000e+00 : f32
    %160 = vector.broadcast %cst_41 : f32 to vector<8x128xf32>
    %161 = arith.addf %160, %159 : vector<8x128xf32>
    %162 = arith.divf %160, %161 : vector<8x128xf32>
    %163 = arith.select %15, %157, %162 : vector<8x128xi1>, vector<8x128xf32>
    %164 = vector.extract_strided_slice %163 {offsets = [0, 0], sizes = [8, 32], strides = [1, 1]} : vector<8x128xf32> to vector<8x32xf32>
    %165 = vector.extract_strided_slice %163 {offsets = [0, 32], sizes = [8, 32], strides = [1, 1]} : vector<8x128xf32> to vector<8x32xf32>
    %166 = vector.extract_strided_slice %163 {offsets = [0, 64], sizes = [8, 32], strides = [1, 1]} : vector<8x128xf32> to vector<8x32xf32>
    %167 = vector.extract_strided_slice %163 {offsets = [0, 96], sizes = [8, 32], strides = [1, 1]} : vector<8x128xf32> to vector<8x32xf32>
    %168 = arith.mulf %165, %143 : vector<8x32xf32>
    %169 = arith.mulf %164, %166 : vector<8x32xf32>
    %170 = arith.addf %168, %169 : vector<8x32xf32>
    %171 = math.tanh %170 : vector<8x32xf32>
    %172 = arith.mulf %167, %171 : vector<8x32xf32>
    %c1_i32_42 = arith.constant 1 : i32
    %173 = arith.addi %c5_i32, %c1_i32_42 : i32
    %174 = vector.broadcast %173 : i32 to vector<8x1xi32>
    %175 = arith.cmpi eq, %8, %174 : vector<8x1xi32>
    %176 = vector.shape_cast %175 : vector<8x1xi1> to vector<8x1xi1>
    %177 = vector.broadcast %176 : vector<8x1xi1> to vector<8x32xi1>
    %178 = arith.select %177, %172, %151 : vector<8x32xi1>, vector<8x32xf32>
    %c6_i32 = arith.constant 6 : i32
    %179 = arith.index_cast %c6_i32 : i32 to index
    %c0_43 = arith.constant 0 : index
    %c0_44 = arith.constant 0 : index
    %180 = vector.load %arg9[%179, %c0_43, %c0_44] : memref<8x8x128xf32, #tpu.memory_space<vmem>>, vector<1x8x128xf32>
    %181 = vector.shape_cast %180 : vector<1x8x128xf32> to vector<8x128xf32>
    %cst_45 = arith.constant dense<0.000000e+00> : vector<8x128xf32>
    %182 = tpu.matmul %172, %9, %cst_45 {dimension_numbers = #tpu.dot_dimension_numbers<[1], [0], [0], [1], [0, 0, 1, 1], [], []>} : vector<8x32xf32>, vector<32x128xf32>, vector<8x128xf32> -> vector<8x128xf32>
    %183 = arith.addf %181, %182 : vector<8x128xf32>
    %184 = math.tanh %183 : vector<8x128xf32>
    %185 = arith.negf %183 : vector<8x128xf32>
    %186 = math.exp %185 : vector<8x128xf32>
    %cst_46 = arith.constant 1.000000e+00 : f32
    %187 = vector.broadcast %cst_46 : f32 to vector<8x128xf32>
    %188 = arith.addf %187, %186 : vector<8x128xf32>
    %189 = arith.divf %187, %188 : vector<8x128xf32>
    %190 = arith.select %15, %184, %189 : vector<8x128xi1>, vector<8x128xf32>
    %191 = vector.extract_strided_slice %190 {offsets = [0, 0], sizes = [8, 32], strides = [1, 1]} : vector<8x128xf32> to vector<8x32xf32>
    %192 = vector.extract_strided_slice %190 {offsets = [0, 32], sizes = [8, 32], strides = [1, 1]} : vector<8x128xf32> to vector<8x32xf32>
    %193 = vector.extract_strided_slice %190 {offsets = [0, 64], sizes = [8, 32], strides = [1, 1]} : vector<8x128xf32> to vector<8x32xf32>
    %194 = vector.extract_strided_slice %190 {offsets = [0, 96], sizes = [8, 32], strides = [1, 1]} : vector<8x128xf32> to vector<8x32xf32>
    %195 = arith.mulf %192, %170 : vector<8x32xf32>
    %196 = arith.mulf %191, %193 : vector<8x32xf32>
    %197 = arith.addf %195, %196 : vector<8x32xf32>
    %198 = math.tanh %197 : vector<8x32xf32>
    %199 = arith.mulf %194, %198 : vector<8x32xf32>
    %c1_i32_47 = arith.constant 1 : i32
    %200 = arith.addi %c6_i32, %c1_i32_47 : i32
    %201 = vector.broadcast %200 : i32 to vector<8x1xi32>
    %202 = arith.cmpi eq, %8, %201 : vector<8x1xi32>
    %203 = vector.shape_cast %202 : vector<8x1xi1> to vector<8x1xi1>
    %204 = vector.broadcast %203 : vector<8x1xi1> to vector<8x32xi1>
    %205 = arith.select %204, %199, %178 : vector<8x32xi1>, vector<8x32xf32>
    %c7_i32 = arith.constant 7 : i32
    %206 = arith.index_cast %c7_i32 : i32 to index
    %c0_48 = arith.constant 0 : index
    %c0_49 = arith.constant 0 : index
    %207 = vector.load %arg9[%206, %c0_48, %c0_49] : memref<8x8x128xf32, #tpu.memory_space<vmem>>, vector<1x8x128xf32>
    %208 = vector.shape_cast %207 : vector<1x8x128xf32> to vector<8x128xf32>
    %cst_50 = arith.constant dense<0.000000e+00> : vector<8x128xf32>
    %209 = tpu.matmul %199, %9, %cst_50 {dimension_numbers = #tpu.dot_dimension_numbers<[1], [0], [0], [1], [0, 0, 1, 1], [], []>} : vector<8x32xf32>, vector<32x128xf32>, vector<8x128xf32> -> vector<8x128xf32>
    %210 = arith.addf %208, %209 : vector<8x128xf32>
    %211 = math.tanh %210 : vector<8x128xf32>
    %212 = arith.negf %210 : vector<8x128xf32>
    %213 = math.exp %212 : vector<8x128xf32>
    %cst_51 = arith.constant 1.000000e+00 : f32
    %214 = vector.broadcast %cst_51 : f32 to vector<8x128xf32>
    %215 = arith.addf %214, %213 : vector<8x128xf32>
    %216 = arith.divf %214, %215 : vector<8x128xf32>
    %217 = arith.select %15, %211, %216 : vector<8x128xi1>, vector<8x128xf32>
    %218 = vector.extract_strided_slice %217 {offsets = [0, 0], sizes = [8, 32], strides = [1, 1]} : vector<8x128xf32> to vector<8x32xf32>
    %219 = vector.extract_strided_slice %217 {offsets = [0, 32], sizes = [8, 32], strides = [1, 1]} : vector<8x128xf32> to vector<8x32xf32>
    %220 = vector.extract_strided_slice %217 {offsets = [0, 64], sizes = [8, 32], strides = [1, 1]} : vector<8x128xf32> to vector<8x32xf32>
    %221 = vector.extract_strided_slice %217 {offsets = [0, 96], sizes = [8, 32], strides = [1, 1]} : vector<8x128xf32> to vector<8x32xf32>
    %222 = arith.mulf %219, %197 : vector<8x32xf32>
    %223 = arith.mulf %218, %220 : vector<8x32xf32>
    %224 = arith.addf %222, %223 : vector<8x32xf32>
    %225 = math.tanh %224 : vector<8x32xf32>
    %226 = arith.mulf %221, %225 : vector<8x32xf32>
    %c1_i32_52 = arith.constant 1 : i32
    %227 = arith.addi %c7_i32, %c1_i32_52 : i32
    %228 = vector.broadcast %227 : i32 to vector<8x1xi32>
    %229 = arith.cmpi eq, %8, %228 : vector<8x1xi32>
    %230 = vector.shape_cast %229 : vector<8x1xi1> to vector<8x1xi1>
    %231 = vector.broadcast %230 : vector<8x1xi1> to vector<8x32xi1>
    %232 = arith.select %231, %226, %205 : vector<8x32xi1>, vector<8x32xf32>
    %c8_i32 = arith.constant 8 : i32
    %c0_53 = arith.constant 0 : index
    %c0_54 = arith.constant 0 : index
    %233 = vector.load %arg6[%c0_53, %c0_54] : memref<32x8xf32, #tpu.memory_space<vmem>>, vector<32x8xf32>
    %cst_55 = arith.constant dense<0.000000e+00> : vector<8x8xf32>
    %234 = tpu.matmul %232, %233, %cst_55 {dimension_numbers = #tpu.dot_dimension_numbers<[1], [0], [0], [1], [0, 0, 1, 1], [], []>} : vector<8x32xf32>, vector<32x8xf32>, vector<8x8xf32> -> vector<8x8xf32>
    %c0_56 = arith.constant 0 : index
    %c0_57 = arith.constant 0 : index
    %235 = vector.load %arg7[%c0_56, %c0_57] : memref<1x8xf32, #tpu.memory_space<vmem>>, vector<1x8xf32>
    %236 = vector.broadcast %235 : vector<1x8xf32> to vector<8x8xf32>
    %237 = arith.addf %234, %236 : vector<8x8xf32>
    %c0_58 = arith.constant 0 : index
    %c0_59 = arith.constant 0 : index
    %238 = vector.load %arg8[%c0_58, %c0_59] : memref<8x8xf32, #tpu.memory_space<vmem>>, vector<8x8xf32>
    tpu.vector_store %arg8[%c0_58, %c0_59], %237 {strides = array<i32>} : memref<8x8xf32, #tpu.memory_space<vmem>>, vector<8x8xf32>,
    return
  }
  func.func @transform_0(%arg0: i32) -> (i32, i32) {
    %c0_i32 = arith.constant 0 : i32
    %c0_i32_0 = arith.constant 0 : i32
    %c0_i32_1 = arith.constant 0 : i32
    return %c0_i32, %c0_i32_0 : i32, i32
  }
  func.func @transform_1(%arg0: i32) -> (i32, i32) {
    %c0_i32 = arith.constant 0 : i32
    %c0_i32_0 = arith.constant 0 : i32
    %c0_i32_1 = arith.constant 0 : i32
    return %c0_i32, %c0_i32_0 : i32, i32
  }
  func.func @transform_2(%arg0: i32) -> (i32, i32) {
    %c0_i32 = arith.constant 0 : i32
    %c0_i32_0 = arith.constant 0 : i32
    %c0_i32_1 = arith.constant 0 : i32
    return %c0_i32, %c0_i32_0 : i32, i32
  }
  func.func @transform_3(%arg0: i32) -> (i32, i32) {
    %c0_i32 = arith.constant 0 : i32
    %c0_i32_0 = arith.constant 0 : i32
    %c0_i32_1 = arith.constant 0 : i32
    return %c0_i32, %c0_i32_0 : i32, i32
  }
  func.func @transform_4(%arg0: i32) -> (i32, i32) {
    %c0_i32 = arith.constant 0 : i32
    %c0_i32_0 = arith.constant 0 : i32
    %c0_i32_1 = arith.constant 0 : i32
    return %c0_i32, %c0_i32_0 : i32, i32
  }
  func.func @transform_5(%arg0: i32) -> (i32, i32) {
    %c0_i32 = arith.constant 0 : i32
    %c0_i32_0 = arith.constant 0 : i32
    %c0_i32_1 = arith.constant 0 : i32
    return %c0_i32, %c0_i32_0 : i32, i32
  }
  func.func @transform_6(%arg0: i32) -> (i32, i32) {
    %c0_i32 = arith.constant 0 : i32
    %c0_i32_0 = arith.constant 0 : i32
    %c0_i32_1 = arith.constant 0 : i32
    return %c0_i32, %c0_i32_0 : i32, i32
  }
  func.func @transform_7(%arg0: i32) -> (i32, i32) {
    %c0_i32 = arith.constant 0 : i32
    %c0_i32_0 = arith.constant 0 : i32
    %c0_i32_1 = arith.constant 0 : i32
    return %c0_i32, %c0_i32_0 : i32, i32
  }
}

</mosaic_0001>

<bundles_post_ra>
// kernel: lstm_forward.1
= control target key start
LH: loop header
LB: loop body
LE: loop exit
PB: predicated region body
PF: predicated region fallthrough
CT: control target
= control target key end

     0   :  { %v1462_v3 = vmov 0.0   ;;  %vm44_vm0 = vcmask 130048   ;;  %s1793_s0 = inlined_call_operand.vmem [shape: s32[8,1], index: 0, kind: input, shape index: {}]   ;;  %s1794_s1 = inlined_call_operand.vmem [shape: f32[64,16], index: 1, kind: input, shape index: {}]   ;;  %s1795_s2 = inlined_call_operand.vmem [shape: f32[16,128], index: 2, kind: input, shape index: {}]   ;;  %s1796_s3 = inlined_call_operand.vmem [shape: f32[32,128], index: 3, kind: input, shape index: {}]   ;;  %s1797_s4 = inlined_call_operand.vmem [shape: f32[1,128], index: 4, kind: input, shape index: {}]   ;;  %s1798_s5 = inlined_call_operand.vmem [shape: f32[32,8], index: 5, kind: input, shape index: {}]   ;;  %s1799_s6 = inlined_call_operand.vmem [shape: f32[1,8], index: 6, kind: input, shape index: {}]   ;;  %s1800_s7 = inlined_call_operand.hbm [shape: f32[8,8], index: 7, kind: output, shape index: {}]  }
   0x1   :  { %v36_v0 = vld [vmem:[%s1795_s2 + $0x8] sm:$0xff]  ;;  %v1514_v1 = vld [vmem:[%s1796_s3 + $0x18] sm:$0xff]  ;;  %v35_v2 = vld [vmem:[%s1795_s2] sm:$0xff]  ;;  %1269 = vmatprep.subr.mxu1 %v1462_v3 }
   0x2   :  { %1253 = vmatprep.subr.mxu0 %v36_v0  ;;  %v27_v4 = vld [vmem:[%s1794_s1] sm:$0xff]  ;;  %1270 = vmatpush3.msra.mxu1 %v1514_v1  ;;  %v1527_v5 = vld [vmem:[%s1796_s3 + $0x10] sm:$0xff]  ;;  %v28_v6 = vld [vmem:[%s1794_s1 + $0x8] sm:$0xff] }
   0x3   :  { %1254 = vmatpush3.msra.mxu0 %v36_v0 }
   0x4   :  { %12 = vsyncpa [#allocation4], 0  ;;  %1255 = vmatprep.subr.mxu0 %v35_v2  ;;  %1271 = vmatprep.subr.mxu1 %v1462_v3  ;;  %v1537_v7 = vld [vmem:[%s1796_s3 + $0x8] sm:$0xff]  ;;  %v1545_v8 = vld [vmem:[%s1796_s3] sm:$0xff]  ;;  %vm1463_vm1 = vmmov 0   ;;  %v187_v19 = vlaneseq  ;;  %s1465_s17 = smov 32  }
   0x5   :  { %1256 = vmatpush3.msra.mxu0 %v35_v2  ;;  %1257 = vmatprep.mubr.msk.f32.mxu0 %vm44_vm0, %v27_v4  ;;  %v1576_v10 = vld [vmem:[%s1797_s4] ss:$0 sm:$0xff]  ;;  %s1464_s4 = smov 64   ;;  %vm193_vm5 = vcmask 261120   ;;  %v29_v49 = vld [vmem:[%s1794_s1 + $0x10] sm:$0xff]  ;;  %v30_v50 = vld [vmem:[%s1794_s1 + $0x18] sm:$0xff] }
   0x6   :  { %1272 = vmatpush3.msra.mxu1 %v1527_v5  ;;  %1258 = vmatmul.mubr.msk.f32.vlgmr.msra.gmra.mxu0 %vm44_vm0, %v28_v6  ;;  %v188_v20 = vand.u32 127, %v187_v19  ;;  %v31_v51 = vld [vmem:[%s1794_s1 + $0x20] sm:$0xff]  ;;  %v32_v52 = vld [vmem:[%s1794_s1 + $0x28] sm:$0xff]  ;;  %v33_v53 = vld [vmem:[%s1794_s1 + $0x30] sm:$0xff]  ;;  %s1467_s15 = smov [#allocation3]  }
   0x7   :  { %1273 = vmatprep.subr.mxu1 %v1462_v3  ;;  %1277 = vmatprep.mubr.msk.f32.mxu1 %vm1463_vm1, %v1462_v3  ;;  %v34_v54 = vld [vmem:[%s1794_s1 + $0x38] sm:$0xff]  ;;  %s1164_s3 = sshll.u32 %s1467_s15, 4  ;;  %s1165_s3 = int_to_ptr.vmem [resolvable:$true] %s1164_s3 }
   0x8   :  { %1274 = vmatpush3.msra.mxu1 %v1537_v7  ;;  %1291 = vmatprep.subr.mxu0 %v1462_v3  ;;  %vm189_vm2 = vcmp.ge.s32.totalorder %v188_v20, 64  ;;  %vm190_vm3 = vcmp.lt.s32.totalorder %v188_v20, 96  ;;  %s1440_s16 = scalar_lea.vmem %s1165_s3, 128  ;;  %p1445_p1 = scmp.lt.s32.totalorder %s1165_s3, %s1165_s3 }
   0x9   :  { %1275 = vmatprep.subr.mxu1 %v1462_v3  ;;  %1292 = vmatpush3.msra.mxu0 %v1514_v1  ;;  %vm1579_vm4 = vmand %vm189_vm2, %vm190_vm3  ;;  %p1441_p0 = scmp.ne.s32.totalorder %s1165_s3, %s1440_s16  ;;  %p1446_p2 = scmp.lt.s32.totalorder %s1440_s16, %s1440_s16 }
   0xa   :  { %1276 = vmatpush3.msra.mxu1 %v1545_v8  ;;  %1293 = vmatprep.subr.mxu0 %v1462_v3 }
   0xb   :  { %1278 = vmatmul.mubr.f32.vlgmr.msra.gmra.mxu1 %v1462_v3  ;;  %1280 = vmatprep.subr.mxu1 %v1462_v3  ;;  %p1447_p3 = por %p1446_p2, %p1445_p1 }
   0xc   :  { %1281 = vmatpush3.msra.mxu1 %v1514_v1  ;;  %1288 = vmatprep.mubr.msk.f32.mxu1 %vm1463_vm1, %v1462_v3 }
   0xd   :  { %1282 = vmatprep.subr.mxu1 %v1462_v3  ;;  %1294 = vmatpush3.msra.mxu0 %v1527_v5  ;;  %p1448_p4 = pnand %p1447_p3, %p1441_p0 }
   0xe   :  { %1283 = vmatpush3.msra.mxu1 %v1527_v5  ;;  %1295 = vmatprep.subr.mxu0 %v1462_v3 }
   0xf   :  { %1284 = vmatprep.subr.mxu1 %v1462_v3  ;;  %1296 = vmatpush3.msra.mxu0 %v1537_v7 }
  0x10   :  { %1285 = vmatpush3.msra.mxu1 %v1537_v7  ;;  %1297 = vmatprep.subr.mxu0 %v1462_v3 }
  0x11   :  { %1286 = vmatprep.subr.mxu1 %v1462_v3  ;;  %1298 = vmatpush3.msra.mxu0 %v1545_v8 }
  0x12   :  { %1287 = vmatpush3.msra.mxu1 %v1545_v8  ;;  %1313 = vmatprep.subr.mxu0 %v1462_v3 }
  0x13   :  { %1302 = vmatprep.subr.mxu1 %v1462_v3  ;;  %1260 = vmatprep.mubr.msk.f32.mxu0 %vm44_vm0, %v29_v49 }
  0x14   :  { %1261 = vmatmul.mubr.msk.f32.gmra.mxu0 %vm44_vm0, %v30_v50 }
  0x15   :  { %1263 = vmatprep.mubr.msk.f32.mxu0 %vm44_vm0, %v31_v51 }
  0x18   :  { %1264 = vmatmul.mubr.msk.f32.gmra.mxu0 %vm44_vm0, %v32_v52 }
  0x19   :  { %1266 = vmatprep.mubr.msk.f32.mxu0 %vm44_vm0, %v33_v53 }
  0x1c   :  { %1267 = vmatmul.mubr.msk.f32.gmra.mxu0 %vm44_vm0, %v34_v54 }
  0x1d   :  { %1299 = vmatprep.mubr.msk.f32.mxu0 %vm1463_vm1, %v1462_v3 }
  0xc6   :  { %v1259_v9 = vpop.f32.mrf.mxu0 }
  0xc7   :  { %v141_v34 = vadd.f32 %v1259_v9, %v1576_v10 }
  0xc8   :  { %v135_v11 = vpop.f32.mrf.mxu0 }
  0xc9   :  { %v136_v12 = vadd.f32 %v1576_v10, %v135_v11 }
  0xcb   :  { %v263_v13 = vpop.f32.mrf.mxu1 }
  0xcc   :  { %v267_v14 = vadd.f32 %v263_v13, %v136_v12 }
  0xcd   :  { %v1279_v15 = vpop.f32.mrf.mxu1 }
  0xce   :  { %v1181_v16 = vmul.f32 -1.442695, %v267_v14 }
  0xd0   :  { %1376 = vpow2.f32 %v1181_v16 }
  0xd1   :  { %1378 = vtanh.f32 %v267_v14 }
  0xd4   :  { %v1262_v59 = vpop.f32.mrf.mxu0 }
  0xd6   :  { %v145_v60 = vpop.f32.mrf.mxu0 }
  0xd7   :  { %v146_v2 = vadd.f32 %v1576_v10, %v145_v60 }
  0xd8   :  { %v1650_v61 = vpop.f32.mrf.mxu0 }
  0xda   :  { %v1652_v62 = vpop.f32.mrf.mxu0 }
  0xdc   :  { %v1654_v63 = vpop.f32.mrf.mxu0 }
  0xdd   :  { %v1377_v17 = vpop.eup %1376 }
  0xde   :  { %v272_v18 = vadd.f32 1.0, %v1377_v17  ;;  %v1379_v22 = vpop.eup %1378  ;;  %v1656_v0 = vpop.f32.mrf.mxu0 }
  0xe0   :  { %1380 = vrcp.f32 %v272_v18 }
  0xed   :  { %v1381_v23 = vpop.eup %1380 }
  0xee   :  { %v275_v24 = vsel %vm1579_vm4, %v1379_v22, %v1381_v23 }
  0xef   :  { %278 = vrot.lane.b32.xlu0 %v275_v24, %s1464_s4  ;;  %v276_v27 = vmul.f32 0.0, %v275_v24 }
 0x161   :  { %v279_v25 = vpop.permute.xlu0 %278 }
 0x162   :  { %v281_v26 = vmul.f32 %v279_v25, %v275_v24 }
 0x164   :  { %283 = vrot.lane.b32.xlu0 %v281_v26, %s1465_s17 }
 0x1d6   :  { %v284_v28 = vpop.permute.xlu0 %283 }
 0x1d7   :  { %v286_v29 = vadd.f32 %v284_v28, %v276_v27  ;;  %v151_v27 = vadd.f32 %v1262_v59, %v1576_v10 }
 0x1d9   :  { %1382 = vtanh.f32 %v286_v29 }
 0x1e6   :  { %v1383_v30 = vpop.eup %1382 }
 0x1e7   :  { %289 = vrot.lane.b32.xlu1 %v1383_v30, %s1464_s4 }
 0x259   :  { %v290_v31 = vpop.permute.xlu1 %289 }
 0x25a   :  { %v1588_v32 = vmul.f32 %v290_v31, %v275_v24 }
 0x25c   :  { %303 = vrot.lane.b32.xlu1 %v1588_v32, %s1465_s17 }
 0x2ce   :  { %v304_v33 = vpop.permute.xlu1 %303 }
 0x2cf   :  { %1289 = vmatmul.mubr.msk.f32.vlgmr.msra.gmra.mxu1 %vm193_vm5, %v304_v33 }
 0x2d0   :  { %1303 = vmatpush3.msra.mxu1 %v1514_v1  ;;  %1310 = vmatprep.mubr.msk.f32.mxu1 %vm1463_vm1, %v1462_v3 }
 0x2d1   :  { %1304 = vmatprep.subr.mxu1 %v1462_v3 }
 0x2d2   :  { %1305 = vmatpush3.msra.mxu1 %v1527_v5 }
 0x2d3   :  { %1306 = vmatprep.subr.mxu1 %v1462_v3 }
 0x2d4   :  { %1307 = vmatpush3.msra.mxu1 %v1537_v7 }
 0x2d5   :  { %1308 = vmatprep.subr.mxu1 %v1462_v3 }
 0x2d6   :  { %1309 = vmatpush3.msra.mxu1 %v1545_v8 }
 0x2d7   :  { %1324 = vmatprep.subr.mxu1 %v1462_v3 }
 0x38f   :  { %v373_v35 = vpop.f32.mrf.mxu1 }
 0x390   :  { %v377_v36 = vadd.f32 %v373_v35, %v141_v34 }
 0x391   :  { %v1290_v37 = vpop.f32.mrf.mxu1 }
 0x392   :  { %v1183_v38 = vmul.f32 -1.442695, %v377_v36 }
 0x394   :  { %1384 = vpow2.f32 %v1183_v38 }
 0x395   :  { %1386 = vtanh.f32 %v377_v36 }
 0x3a1   :  { %v1385_v39 = vpop.eup %1384 }
 0x3a2   :  { %v382_v40 = vadd.f32 1.0, %v1385_v39  ;;  %v1387_v41 = vpop.eup %1386 }
 0x3a4   :  { %1388 = vrcp.f32 %v382_v40 }
 0x3b1   :  { %v1389_v42 = vpop.eup %1388 }
 0x3b2   :  { %v385_v43 = vsel %vm1579_vm4, %v1387_v41, %v1389_v42 }
 0x3b3   :  { %388 = vrot.lane.b32.xlu0 %v385_v43, %s1464_s4  ;;  %v386_v46 = vmul.f32 %v385_v43, %v286_v29 }
 0x425   :  { %v389_v44 = vpop.permute.xlu0 %388 }
 0x426   :  { %v391_v45 = vmul.f32 %v389_v44, %v385_v43 }
 0x428   :  { %393 = vrot.lane.b32.xlu1 %v391_v45, %s1465_s17 }
 0x49a   :  { %v394_v47 = vpop.permute.xlu1 %393 }
 0x49b   :  { %v396_v48 = vadd.f32 %v394_v47, %v386_v46  ;;  %v156_v47 = vadd.f32 %v1576_v10, %v1652_v62 }
 0x49d   :  { %1390 = vtanh.f32 %v396_v48 }
 0x4aa   :  { %v1391_v55 = vpop.eup %1390 }
 0x4ab   :  { %399 = vrot.lane.b32.xlu0 %v1391_v55, %s1464_s4 }
 0x51d   :  { %v400_v56 = vpop.permute.xlu0 %399 }
 0x51e   :  { %v1635_v57 = vmul.f32 %v400_v56, %v385_v43 }
 0x520   :  { %413 = vrot.lane.b32.xlu1 %v1635_v57, %s1465_s17 }
 0x592   :  { %v414_v58 = vpop.permute.xlu1 %413 }
 0x593   :  { %1300 = vmatmul.mubr.msk.f32.vlgmr.msra.gmra.mxu0 %vm193_vm5, %v414_v58 }
 0x594   :  { %1314 = vmatpush3.msra.mxu0 %v1514_v1  ;;  %1321 = vmatprep.mubr.msk.f32.mxu0 %vm1463_vm1, %v1462_v3 }
 0x595   :  { %1315 = vmatprep.subr.mxu0 %v1462_v3 }
 0x596   :  { %1316 = vmatpush3.msra.mxu0 %v1527_v5 }
 0x597   :  { %1317 = vmatprep.subr.mxu0 %v1462_v3 }
 0x598   :  { %1318 = vmatpush3.msra.mxu0 %v1537_v7 }
 0x599   :  { %1319 = vmatprep.subr.mxu0 %v1462_v3 }
 0x59a   :  { %1320 = vmatpush3.msra.mxu0 %v1545_v8 }
 0x59b   :  { %1335 = vmatprep.subr.mxu0 %v1462_v3 }
 0x653   :  { %v483_v4 = vpop.f32.mrf.mxu0 }
 0x654   :  { %v487_v6 = vadd.f32 %v483_v4, %v146_v2 }
 0x655   :  { %v1301_v9 = vpop.f32.mrf.mxu0 }
 0x656   :  { %v1185_v11 = vmul.f32 -1.442695, %v487_v6 }
 0x658   :  { %1392 = vpow2.f32 %v1185_v11 }
 0x659   :  { %1394 = vtanh.f32 %v487_v6 }
 0x665   :  { %v1393_v12 = vpop.eup %1392 }
 0x666   :  { %v492_v13 = vadd.f32 1.0, %v1393_v12  ;;  %v1395_v14 = vpop.eup %1394  ;;  %v161_v12 = vadd.f32 %v1650_v61, %v1576_v10 }
 0x668   :  { %1396 = vrcp.f32 %v492_v13 }
 0x675   :  { %v1397_v15 = vpop.eup %1396 }
 0x676   :  { %v495_v16 = vsel %vm1579_vm4, %v1395_v14, %v1397_v15 }
 0x677   :  { %498 = vrot.lane.b32.xlu0 %v495_v16, %s1464_s4  ;;  %v496_v19 = vmul.f32 %v495_v16, %v396_v48 }
 0x6e9   :  { %v499_v17 = vpop.permute.xlu0 %498 }
 0x6ea   :  { %v501_v18 = vmul.f32 %v499_v17, %v495_v16 }
 0x6ec   :  { %503 = vrot.lane.b32.xlu1 %v501_v18, %s1465_s17 }
 0x75e   :  { %v504_v20 = vpop.permute.xlu1 %503 }
 0x75f   :  { %v506_v22 = vadd.f32 %v504_v20, %v496_v19 }
 0x761   :  { %1398 = vtanh.f32 %v506_v22 }
 0x76e   :  { %v1399_v23 = vpop.eup %1398 }
 0x76f   :  { %509 = vrot.lane.b32.xlu0 %v1399_v23, %s1464_s4 }
 0x7e1   :  { %v510_v24 = vpop.permute.xlu0 %509 }
 0x7e2   :  { %v1664_v25 = vmul.f32 %v510_v24, %v495_v16 }
 0x7e4   :  { %523 = vrot.lane.b32.xlu1 %v1664_v25, %s1465_s17 }
 0x856   :  { %v524_v26 = vpop.permute.xlu1 %523 }
 0x857   :  { %1311 = vmatmul.mubr.msk.f32.vlgmr.msra.gmra.mxu1 %vm193_vm5, %v524_v26 }
 0x858   :  { %1325 = vmatpush3.msra.mxu1 %v1514_v1  ;;  %1332 = vmatprep.mubr.msk.f32.mxu1 %vm1463_vm1, %v1462_v3 }
 0x859   :  { %1326 = vmatprep.subr.mxu1 %v1462_v3 }
 0x85a   :  { %1327 = vmatpush3.msra.mxu1 %v1527_v5 }
 0x85b   :  { %1328 = vmatprep.subr.mxu1 %v1462_v3 }
 0x85c   :  { %1329 = vmatpush3.msra.mxu1 %v1537_v7 }
 0x85d   :  { %1330 = vmatprep.subr.mxu1 %v1462_v3 }
 0x85e   :  { %1331 = vmatpush3.msra.mxu1 %v1545_v8 }
 0x85f   :  { %1346 = vmatprep.subr.mxu1 %v1462_v3 }
 0x917   :  { %v593_v28 = vpop.f32.mrf.mxu1 }
 0x918   :  { %v597_v29 = vadd.f32 %v593_v28, %v151_v27  ;;  %v166_v28 = vadd.f32 %v1576_v10, %v1656_v0 }
 0x919   :  { %v1312_v30 = vpop.f32.mrf.mxu1 }
 0x91a   :  { %v1187_v31 = vmul.f32 -1.442695, %v597_v29 }
 0x91c   :  { %1400 = vpow2.f32 %v1187_v31 }
 0x91d   :  { %1402 = vtanh.f32 %v597_v29 }
 0x929   :  { %v1401_v33 = vpop.eup %1400 }
 0x92a   :  { %v602_v34 = vadd.f32 1.0, %v1401_v33  ;;  %v1403_v35 = vpop.eup %1402 }
 0x92c   :  { %1404 = vrcp.f32 %v602_v34 }
 0x939   :  { %v1405_v36 = vpop.eup %1404 }
 0x93a   :  { %v605_v37 = vsel %vm1579_vm4, %v1403_v35, %v1405_v36 }
 0x93b   :  { %608 = vrot.lane.b32.xlu0 %v605_v37, %s1464_s4  ;;  %v606_v40 = vmul.f32 %v605_v37, %v506_v22 }
 0x9ad   :  { %v609_v38 = vpop.permute.xlu0 %608 }
 0x9ae   :  { %v611_v39 = vmul.f32 %v609_v38, %v605_v37 }
 0x9b0   :  { %613 = vrot.lane.b32.xlu1 %v611_v39, %s1465_s17 }
 0xa22   :  { %v614_v41 = vpop.permute.xlu1 %613 }
 0xa23   :  { %v616_v42 = vadd.f32 %v614_v41, %v606_v40 }
 0xa25   :  { %1406 = vtanh.f32 %v616_v42 }
 0xa32   :  { %v1407_v43 = vpop.eup %1406 }
 0xa33   :  { %619 = vrot.lane.b32.xlu0 %v1407_v43, %s1464_s4 }
 0xaa5   :  { %v620_v44 = vpop.permute.xlu0 %619 }
 0xaa6   :  { %v1685_v45 = vmul.f32 %v620_v44, %v605_v37 }
 0xaa8   :  { %633 = vrot.lane.b32.xlu1 %v1685_v45, %s1465_s17 }
 0xb1a   :  { %v634_v46 = vpop.permute.xlu1 %633 }
 0xb1b   :  { %1322 = vmatmul.mubr.msk.f32.vlgmr.msra.gmra.mxu0 %vm193_vm5, %v634_v46 }
 0xb1c   :  { %1336 = vmatpush3.msra.mxu0 %v1514_v1  ;;  %1343 = vmatprep.mubr.msk.f32.mxu0 %vm1463_vm1, %v1462_v3 }
 0xb1d   :  { %1337 = vmatprep.subr.mxu0 %v1462_v3 }
 0xb1e   :  { %1338 = vmatpush3.msra.mxu0 %v1527_v5 }
 0xb1f   :  { %1339 = vmatprep.subr.mxu0 %v1462_v3 }
 0xb20   :  { %1340 = vmatpush3.msra.mxu0 %v1537_v7 }
 0xb21   :  { %1341 = vmatprep.subr.mxu0 %v1462_v3 }
 0xb22   :  { %1342 = vmatpush3.msra.mxu0 %v1545_v8 }
 0xb23   :  { %1357 = vmatprep.subr.mxu0 %v1462_v3 }
 0xbdb   :  { %v703_v48 = vpop.f32.mrf.mxu0 }
 0xbdc   :  { %v707_v49 = vadd.f32 %v703_v48, %v156_v47  ;;  %v1466_v48 = vmov 0  }
 0xbdd   :  { %v1323_v50 = vpop.f32.mrf.mxu0  ;;  %1374 = vset.pattern.permute.xlu0 %v1466_v48  ;;  %1375 = vset.pattern.permute.xlu1 %v1466_v48 }
 0xbde   :  { %v1189_v51 = vmul.f32 -1.442695, %v707_v49 }
 0xbe0   :  { %1408 = vpow2.f32 %v1189_v51 }
 0xbe1   :  { %1410 = vtanh.f32 %v707_v49  ;;  %v171_v49 = vadd.f32 %v1654_v63, %v1576_v10 }
 0xbed   :  { %v1409_v52 = vpop.eup %1408 }
 0xbee   :  { %v712_v53 = vadd.f32 1.0, %v1409_v52  ;;  %v1411_v54 = vpop.eup %1410 }
 0xbf0   :  { %1412 = vrcp.f32 %v712_v53 }
 0xbfd   :  { %v1413_v55 = vpop.eup %1412 }
 0xbfe   :  { %v715_v56 = vsel %vm1579_vm4, %v1411_v54, %v1413_v55 }
 0xbff   :  { %718 = vrot.lane.b32.xlu0 %v715_v56, %s1464_s4  ;;  %v716_v60 = vmul.f32 %v715_v56, %v616_v42 }
 0xc71   :  { %v719_v58 = vpop.permute.xlu0 %718 }
 0xc72   :  { %v721_v59 = vmul.f32 %v719_v58, %v715_v56 }
 0xc74   :  { %723 = vrot.lane.b32.xlu1 %v721_v59, %s1465_s17 }
 0xce6   :  { %v724_v62 = vpop.permute.xlu1 %723 }
 0xce7   :  { %v726_v2 = vadd.f32 %v724_v62, %v716_v60 }
 0xce9   :  { %1414 = vtanh.f32 %v726_v2 }
 0xcf6   :  { %v1415_v4 = vpop.eup %1414 }
 0xcf7   :  { %729 = vrot.lane.b32.xlu0 %v1415_v4, %s1464_s4 }
 0xd69   :  { %v730_v6 = vpop.permute.xlu0 %729 }
 0xd6a   :  { %v1707_v9 = vmul.f32 %v730_v6, %v715_v56  ;;  %v182_v56 = vld [vmem:[%s1793_s0] sm:$0xff] }
 0xd6b   :  { %vm293_vm6 = vcmp.eq.s32.totalorder %v182_v56, 1  ;;  %vm623_vm7 = vcmp.eq.s32.totalorder %v182_v56, 4  ;;  %vm843_vm8 = vcmp.eq.s32.totalorder %v182_v56, 6  ;;  %vm1063_vm9 = vcmp.eq.s32.totalorder %v182_v56, 8 }
 0xd6c   :  { %743 = vrot.lane.b32.xlu1 %v1707_v9, %s1465_s17  ;;  %v294_v10 = vsel %vm293_vm6, 1, %v1466_v48  ;;  %v624_v63 = vsel %vm623_vm7, 1, %v1466_v48  ;;  %v844_v62 = vsel %vm843_vm8, 1, %v1466_v48  ;;  %vm403_vm10 = vcmp.eq.s32.totalorder %v182_v56, 2 }
 0xd6d   :  { %v404_v21 = vsel %vm403_vm10, 1, %v1466_v48  ;;  %vm513_vm11 = vcmp.eq.s32.totalorder %v182_v56, 3  ;;  %vm733_vm12 = vcmp.eq.s32.totalorder %v182_v56, 5  ;;  %vm953_vm13 = vcmp.eq.s32.totalorder %v182_v56, 7 }
 0xd6e   :  { %vm1156_vm7 = vcmask 64512  }
 0xdde   :  { %v744_v11 = vpop.permute.xlu1 %743 }
 0xddf   :  { %1333 = vmatmul.mubr.msk.f32.vlgmr.msra.gmra.mxu1 %vm193_vm5, %v744_v11  ;;  %v514_v11 = vsel %vm513_vm11, 1, %v1466_v48 }
 0xde0   :  { %1347 = vmatpush3.msra.mxu1 %v1514_v1  ;;  %1354 = vmatprep.mubr.msk.f32.mxu1 %vm1463_vm1, %v1462_v3 }
 0xde1   :  { %1348 = vmatprep.subr.mxu1 %v1462_v3 }
 0xde2   :  { %1349 = vmatpush3.msra.mxu1 %v1527_v5 }
 0xde3   :  { %1350 = vmatprep.subr.mxu1 %v1462_v3 }
 0xde4   :  { %1351 = vmatpush3.msra.mxu1 %v1537_v7 }
 0xde5   :  { %1352 = vmatprep.subr.mxu1 %v1462_v3 }
 0xde6   :  { %1353 = vmatpush3.msra.mxu1 %v1545_v8 }
 0xe9f   :  { %v813_v13 = vpop.f32.mrf.mxu1 }
 0xea0   :  { %v817_v1 = vadd.f32 %v813_v13, %v161_v12  ;;  %v734_v12 = vsel %vm733_vm12, 1, %v1466_v48  ;;  %v954_v13 = vsel %vm953_vm13, 1, %v1466_v48 }
 0xea1   :  { %v1334_v14 = vpop.f32.mrf.mxu1 }
 0xea2   :  { %v1191_v15 = vmul.f32 -1.442695, %v817_v1 }
 0xea4   :  { %1416 = vpow2.f32 %v1191_v15 }
 0xea5   :  { %1418 = vtanh.f32 %v817_v1 }
 0xeb1   :  { %v1417_v16 = vpop.eup %1416 }
 0xeb2   :  { %v822_v17 = vadd.f32 1.0, %v1417_v16  ;;  %v1419_v5 = vpop.eup %1418  ;;  %v1073_v16 = vld [vmem:[%s1798_s5 + $0x18] sm:$0xff] }
 0xeb4   :  { %1420 = vrcp.f32 %v822_v17  ;;  %v1072_v17 = vld [vmem:[%s1798_s5 + $0x10] sm:$0xff] }
 0xec1   :  { %v1421_v18 = vpop.eup %1420 }
 0xec2   :  { %v825_v7 = vsel %vm1579_vm4, %v1419_v5, %v1421_v18  ;;  %v1071_v5 = vld [vmem:[%s1798_s5 + $0x8] sm:$0xff]  ;;  %v1070_v18 = vld [vmem:[%s1798_s5] sm:$0xff] }
 0xec3   :  { %828 = vrot.lane.b32.xlu0 %v825_v7, %s1464_s4  ;;  %v826_v61 = vmul.f32 %v825_v7, %v726_v2  ;;  %v1064_v2 = vsel %vm1063_vm9, 1, %v1466_v48 }
 0xf35   :  { %v829_v8 = vpop.permute.xlu0 %828 }
 0xf36   :  { %v831_v19 = vmul.f32 %v829_v8, %v825_v7 }
 0xf38   :  { %833 = vrot.lane.b32.xlu1 %v831_v19, %s1465_s17 }
 0xfaa   :  { %v834_v20 = vpop.permute.xlu1 %833 }
 0xfab   :  { %v836_v22 = vadd.f32 %v834_v20, %v826_v61 }
 0xfad   :  { %1422 = vtanh.f32 %v836_v22 }
 0xfba   :  { %v1423_v23 = vpop.eup %1422 }
 0xfbb   :  { %839 = vrot.lane.b32.xlu0 %v1423_v23, %s1464_s4 }
0x102d   :  { %v840_v24 = vpop.permute.xlu0 %839 }
0x102e   :  { %v1728_v26 = vmul.f32 %v840_v24, %v825_v7 }
0x1030   :  { %853 = vrot.lane.b32.xlu1 %v1728_v26, %s1465_s17 }
0x10a2   :  { %v854_v27 = vpop.permute.xlu1 %853 }
0x10a3   :  { %1344 = vmatmul.mubr.msk.f32.vlgmr.msra.gmra.mxu0 %vm193_vm5, %v854_v27 }
0x10a4   :  { %1365 = vmatprep.mubr.msk.f32.mxu0 %vm1463_vm1, %v1462_v3  ;;  %1358 = vmatpush3.msra.mxu0 %v1073_v16 }
0x10a5   :  { %1359 = vmatprep.subr.mxu0 %v1462_v3 }
0x10a6   :  { %1360 = vmatpush3.msra.mxu0 %v1072_v17 }
0x10a7   :  { %1361 = vmatprep.subr.mxu0 %v1462_v3 }
0x10a8   :  { %1362 = vmatpush3.msra.mxu0 %v1071_v5 }
0x10a9   :  { %1363 = vmatprep.subr.mxu0 %v1462_v3 }
0x10aa   :  { %1364 = vmatpush3.msra.mxu0 %v1070_v18 }
0x1163   :  { %v923_v29 = vpop.f32.mrf.mxu0 }
0x1164   :  { %v927_v30 = vadd.f32 %v923_v29, %v166_v28 }
0x1165   :  { %v1345_v31 = vpop.f32.mrf.mxu0 }
0x1166   :  { %v1193_v33 = vmul.f32 -1.442695, %v927_v30 }
0x1168   :  { %1424 = vpow2.f32 %v1193_v33 }
0x1169   :  { %1426 = vtanh.f32 %v927_v30 }
0x1175   :  { %v1425_v34 = vpop.eup %1424 }
0x1176   :  { %v932_v35 = vadd.f32 1.0, %v1425_v34  ;;  %v1427_v36 = vpop.eup %1426 }
0x1178   :  { %1428 = vrcp.f32 %v932_v35 }
0x1185   :  { %v1429_v37 = vpop.eup %1428 }
0x1186   :  { %v935_v38 = vsel %vm1579_vm4, %v1427_v36, %v1429_v37 }
0x1187   :  { %938 = vrot.lane.b32.xlu0 %v935_v38, %s1464_s4  ;;  %v936_v0 = vmul.f32 %v935_v38, %v836_v22 }
0x11f9   :  { %v939_v39 = vpop.permute.xlu0 %938 }
0x11fa   :  { %v941_v40 = vmul.f32 %v939_v39, %v935_v38 }
0x11fc   :  { %943 = vrot.lane.b32.xlu1 %v941_v40, %s1465_s17 }
0x126e   :  { %v944_v41 = vpop.permute.xlu1 %943 }
0x126f   :  { %v946_v42 = vadd.f32 %v944_v41, %v936_v0 }
0x1271   :  { %1430 = vtanh.f32 %v946_v42 }
0x127e   :  { %v1431_v43 = vpop.eup %1430 }
0x127f   :  { %949 = vrot.lane.b32.xlu0 %v1431_v43, %s1464_s4 }
0x12f1   :  { %v950_v44 = vpop.permute.xlu0 %949 }
0x12f2   :  { %v1742_v46 = vmul.f32 %v950_v44, %v935_v38 }
0x12f4   :  { %963 = vrot.lane.b32.xlu1 %v1742_v46, %s1465_s17 }
0x1366   :  { %v964_v47 = vpop.permute.xlu1 %963 }
0x1367   :  { %1355 = vmatmul.mubr.msk.f32.vlgmr.msra.gmra.mxu1 %vm193_vm5, %v964_v47 }
0x1427   :  { %v1033_v50 = vpop.f32.mrf.mxu1 }
0x1428   :  { %v1037_v51 = vadd.f32 %v1033_v50, %v171_v49 }
0x1429   :  { %v1356_v52 = vpop.f32.mrf.mxu1 }
0x142a   :  { %v1195_v53 = vmul.f32 -1.442695, %v1037_v51 }
0x142c   :  { %1432 = vpow2.f32 %v1195_v53 }
0x142d   :  { %1434 = vtanh.f32 %v1037_v51 }
0x1439   :  { %v1433_v54 = vpop.eup %1432 }
0x143a   :  { %v1042_v55 = vadd.f32 1.0, %v1433_v54  ;;  %v1435_v58 = vpop.eup %1434 }
0x143c   :  { %1436 = vrcp.f32 %v1042_v55 }
0x1449   :  { %v1437_v59 = vpop.eup %1436 }
0x144a   :  { %v1754_v60 = vsel %vm1579_vm4, %v1435_v58, %v1437_v59 }
0x144b   :  { %1048 = vrot.lane.b32.xlu0 %v1754_v60, %s1464_s4  ;;  %v1046_v1 = vmul.f32 %v1754_v60, %v946_v42 }
0x144f   :  { %296 = vperm.xlu0 %1374, %v294_v10  }
0x1453   :  { %626 = vperm.xlu0 %1374, %v624_v63  }
0x1457   :  { %846 = vperm.xlu0 %1374, %v844_v62  }
0x145b   :  { %1066 = vperm.xlu0 %1374, %v1064_v2  }
0x14bd   :  { %v1049_v4 = vpop.permute.xlu0 %1048 }
0x14be   :  { %v1051_v6 = vmul.f32 %v1049_v4, %v1754_v60 }
0x14c0   :  { %1053 = vrot.lane.b32.xlu1 %v1051_v6, %s1465_s17 }
0x14c4   :  { %406 = vperm.xlu1 %1375, %v404_v21  }
0x14c8   :  { %516 = vperm.xlu1 %1375, %v514_v11  }
0x14ca   :  { %v297_v61 = vpop.permute.xlu0 %296 }
0x14cb   :  { %vm298_vm14 = vcmp.eq.s32.totalorder %v297_v61, 1 }
0x14cc   :  { %736 = vperm.xlu1 %1375, %v734_v12   ;;  %v299_v23 = vsel %vm298_vm14, %v1588_v32, 0.0 }
0x14ce   :  { %v627_v20 = vpop.permute.xlu0 %626 }
0x14cf   :  { %vm628_vm1 = vcmp.eq.s32.totalorder %v627_v20, 1 }
0x14d0   :  { %956 = vperm.xlu1 %1375, %v954_v13  }
0x14d2   :  { %v847_v3 = vpop.permute.xlu0 %846 }
0x14d3   :  { %vm848_vm3 = vcmp.eq.s32.totalorder %v847_v3, 1 }
0x14d6   :  { %v1067_v31 = vpop.permute.xlu0 %1066 }
0x14d7   :  { %vm1068_vm6 = vcmp.eq.s32.totalorder %v1067_v31, 1 }
0x1532   :  { %v1054_v14 = vpop.permute.xlu1 %1053 }
0x1533   :  { %v1056_v15 = vadd.f32 %v1054_v14, %v1046_v1 }
0x1535   :  { %1438 = vtanh.f32 %v1056_v15 }
0x153f   :  { %v407_v8 = vpop.permute.xlu1 %406 }
0x1540   :  { %vm408_vm15 = vcmp.eq.s32.totalorder %v407_v8, 1 }
0x1541   :  { %v409_v24 = vsel %vm408_vm15, %v1635_v57, %v299_v23 }
0x1542   :  { %v1439_v7 = vpop.eup %1438 }
0x1543   :  { %1059 = vrot.lane.b32.xlu1 %v1439_v7, %s1464_s4  ;;  %v517_v19 = vpop.permute.xlu1 %516 }
0x1544   :  { %vm518_vm0 = vcmp.eq.s32.totalorder %v517_v19, 1 }
0x1545   :  { %v519_v27 = vsel %vm518_vm0, %v1664_v25, %v409_v24 }
0x1546   :  { %v629_v29 = vsel %vm628_vm1, %v1685_v45, %v519_v27  ;;  %v1196_v45 = vld [vmem:[%s1799_s6] ss:$0 sm:$0xff] }
0x1547   :  { %v737_v22 = vpop.permute.xlu1 %736 }
0x1548   :  { %vm738_vm2 = vcmp.eq.s32.totalorder %v737_v22, 1 }
0x1549   :  { %v739_v30 = vsel %vm738_vm2, %v1707_v9, %v629_v29 }
0x154a   :  { %v849_v34 = vsel %vm848_vm3, %v1728_v26, %v739_v30 }
0x154b   :  { %v957_v28 = vpop.permute.xlu1 %956 }
0x154c   :  { %vm958_vm4 = vcmp.eq.s32.totalorder %v957_v28, 1 }
0x154d   :  { %v959_v57 = vsel %vm958_vm4, %v1742_v46, %v849_v34 }
0x15b5   :  { %v1060_v33 = vpop.permute.xlu1 %1059 }
0x15b6   :  { %v1062_v32 = vmul.f32 %v1060_v33, %v1754_v60 }
0x15b8   :  { %v1069_v25 = vsel %vm1068_vm6, %v1062_v32, %v959_v57 }
0x15b9   :  { %1082 = vrot.lane.b32.xlu0 %v1069_v25, %s1465_s17 }
0x162b   :  { %v1083_v35 = vpop.permute.xlu0 %1082 }
0x162c   :  { %1366 = vmatmul.mubr.msk.f32.vlgmr.msra.gmra.mxu0 %vm193_vm5, %v1083_v35 }
0x16ec   :  { %v1152_v9 = vpop.f32.mrf.mxu0 }
0x16ed   :  { %v1153_v26 = vadd.f32 %v1196_v45, %v1152_v9 }
0x16ee   :  { %v1367_v36 = vpop.f32.mrf.mxu0 }
0x16ef   :  { %1157 = vst.msk [vmem:[#allocation3] sm:$0xff] %vm1156_vm7, %v1153_v26 }
0x16f0   :  { %1451 = shalt.err (!%p1448_p4)
}
0x16f1   :  { %1167 = dma.vmem_to_hbm [thread:$0]  %s1165_s3, 128, %s1800_s7, [#allocation4]  }
0x16f2   :  { %1460 = dma.done.wait [#allocation4], 128  }
0x16f3   :  { %1461 = vsyncadd [#allocation4], 4294967168 }
0x16f4   :  { %1171 = vsyncpa [#allocation4], 1 }

</bundles_post_ra>
